<compile_context>
chip_gen: v7x
topology: tpu7x:2x2x1
jax: 0.10.0
libtpu: 0.0.40
codegen_flags: <defaults>
</compile_context>

<pallas_src>
import jax
import jax.numpy as jnp
from jax.experimental import pallas as pl
from jax.experimental.pallas import tpu as pltpu


def _bahdanau_kernel(hidden_ref, values_ref,
                     w1_ref, b1_ref, w2_ref, b2_ref, v_ref,
                     ctx_ref, attn_ref):
    Bb, T, F = values_ref.shape
    H = w1_ref.shape[1]
    NT = v_ref.shape[1]
    mx = w1_ref.dtype            # MXU operand dtype (bf16 in production, f32 for validation)

    # Cast once; reused by both the W1 matmul and the context contraction.
    vals = values_ref[...].astype(mx)                            # (Bb, T, F)
    h = hidden_ref[...].astype(mx)                               # (Bb, F)

    # W1(values): one (Bb*T, F) @ (F, H) MXU matmul, f32 accumulation.
    s1 = jnp.dot(vals.reshape(Bb * T, F), w1_ref[...],
                 preferred_element_type=jnp.float32)             # (Bb*T, H)

    # W2(hidden) with both Linear biases folded in once per batch row (f32).
    s2 = (jnp.dot(h, w2_ref[...], preferred_element_type=jnp.float32)
          + b1_ref[...] + b2_ref[...])                           # (Bb, H)

    # Elementwise math stays f32 (v5e has no bf16 VPU/EUP path).
    t = jnp.tanh(s1.reshape(Bb, T, H) + s2[:, None, :])          # (Bb, T, H)

    # V(tanh(...)) -> scores.  V's bias is dropped: softmax over T is invariant
    # to a constant per-(b, task) shift, so it is mathematically dead.
    score = jnp.dot(t.reshape(Bb * T, H).astype(mx), v_ref[...],
                    preferred_element_type=jnp.float32)          # (Bb*T, NT)

    # Swap the (small) score tensor so T sits in the lane dim: the softmax's
    # exp/max/sum/mul become lane-dense and the attn store is lane-dense too.
    score_t = jnp.swapaxes(score.reshape(Bb, T, NT), 1, 2)       # (Bb, NT, T)

    m = jnp.max(score_t, axis=-1, keepdims=True)
    e = jnp.exp(score_t - m)
    denom = jnp.sum(e, axis=-1, keepdims=True)
    inv = pl.reciprocal(denom, approx=True)                      # EUP
    inv = inv * (2.0 - denom * inv)                              # one Newton step -> f32 accuracy
    attn = e * inv                                               # (Bb, NT, T)
    attn_ref[...] = attn.astype(attn_ref.dtype)

    # context[b] = attn_t[b] @ values[b]: batched contraction over T.
    # TODO(synk): if bundle profiling shows MXU drain stalls from the tiny-M (=NT)
    # per-batch matmuls, switch this to a VPU broadcast-multiply + reduce over T.
    ctx = jax.lax.dot_general(
        attn.astype(mx), vals,
        dimension_numbers=(((2,), (1,)), ((0,), (0,))),
        preferred_element_type=jnp.float32)                      # (Bb, NT, F)
    ctx_ref[...] = ctx.astype(ctx_ref.dtype)


def _vmem_budget_bytes(frac=0.7, default_cap=128 * 1024 * 1024):
    """~70% of physical VMEM: ~45 MiB on v7x (64 MiB), ~90 MiB on v5e/v6e (128 MiB)."""
    try:
        cap = int(getattr(pltpu.get_tpu_info(), "vmem_capacity_bytes", default_cap))
    except Exception:
        cap = default_cap
    return int(cap * frac)


def _pick_batch_block(B, T, F, H, NT, *, io_itemsize, w_itemsize,
                      vmem_budget_bytes, target_rows=1024):
    """Largest Bb dividing B such that:
      (a) Bb % 8 == 0 or Bb == B     (keeps the (Bb, F) hidden block sublane-legal),
      (b) the per-step VMEM working set fits the budget,
      (c) Bb*T stays near target_rows (amortize ~0.35us/step pipeline overhead),
      (d) grid >= 2 when possible so both v7x TensorCores get work."""
    def step_bytes(bb):
        io = 2 * io_itemsize * (bb * T * F + bb * F + bb * NT * F + bb * NT * T)  # double-buffered blocks
        inter = 4 * bb * (T * (2 * H + 4 * NT) + H + NT * F)                      # f32 intermediates
        wts = w_itemsize * (2 * F * H + H * NT) + 4 * 2 * H                       # resident weights + biases
        return io + inter + wts

    valid = [bb for bb in range(B, 0, -1) if B % bb == 0 and (bb == B or bb % 8 == 0)]
    fits = [bb for bb in valid if step_bytes(bb) <= vmem_budget_bytes] or [valid[-1]]
    sized = [bb for bb in fits if bb * T <= target_rows] or [fits[-1]]
    multi = [bb for bb in sized if bb < B]        # grid >= 2 -> shard across v7x's 2 TCs
    return (multi or sized)[0]


def bahdanau_attention(hidden_states, values, params, *, batch_block=None,
                       mxu_dtype=jnp.bfloat16, single_buffer_weights=True):
    """hidden_states: (B, F); values: (B, T, F). Returns (context (B,NT,F), attn (B,T,NT))."""
    B, T, F = values.shape
    H = params["w1"].shape[1]
    NT = params["v"].shape[1]
    out_dtype = values.dtype

    # Weights cast once, host-side, to the MXU operand dtype; biases stay f32.
    w1 = params["w1"].astype(mxu_dtype)
    w2 = params["w2"].astype(mxu_dtype)
    v = params["v"].astype(mxu_dtype)
    b1 = params["b1"].astype(jnp.float32)
    b2 = params["b2"].astype(jnp.float32)
    # params["bv"] (V's bias) is intentionally not passed: softmax cancels it.

    io_itemsize = jnp.dtype(out_dtype).itemsize
    w_itemsize = jnp.dtype(mxu_dtype).itemsize
    budget = _vmem_budget_bytes()

    Bb = batch_block if batch_block is not None else _pick_batch_block(
        B, T, F, H, NT, io_itemsize=io_itemsize, w_itemsize=w_itemsize,
        vmem_budget_bytes=budget)
    assert B % Bb == 0, f"batch block {Bb} must divide batch {B}"
    assert Bb == B or Bb % 8 == 0, (
        f"batch block {Bb} must be a multiple of 8 (hidden (Bb,F) sublane rule) or equal B={B}")
    grid = (B // Bb,)

    flops = (2 * B * T * F * H        # W1
             + 2 * B * F * H          # W2
             + 2 * B * T * H * NT     # V
             + 2 * B * T * NT * F)    # context
    transcendentals = B * T * H + B * T * NT
    bytes_accessed = (io_itemsize * (B * T * F + B * F + B * NT * F + B * NT * T)
                      + w_itemsize * (2 * F * H + H * NT) + 4 * 2 * H)

    def run(single_buffer):
        if single_buffer:
            # Constant index_map -> never re-fetched; single-buffering halves weight VMEM.
            def wspec(shape):
                return pl.BlockSpec(shape, lambda i: (0,) * len(shape),
                                    pipeline_mode=pl.Buffered(1))
        else:
            def wspec(shape):
                return pl.BlockSpec(shape, lambda i: (0,) * len(shape))

        grid_spec = pltpu.PrefetchScalarGridSpec(
            num_scalar_prefetch=0,
            grid=grid,
            in_specs=[
                pl.BlockSpec((Bb, F), lambda i: (i, 0)),          # hidden
                pl.BlockSpec((Bb, T, F), lambda i: (i, 0, 0)),    # values
                wspec((F, H)),                                    # W1 (pre-transposed)
                wspec((1, H)),                                    # b1
                wspec((F, H)),                                    # W2 (pre-transposed)
                wspec((1, H)),                                    # b2
                wspec((H, NT)),                                   # V (pre-transposed)
            ],
            out_specs=[
                pl.BlockSpec((Bb, NT, F), lambda i: (i, 0, 0)),   # context_vector
                pl.BlockSpec((Bb, NT, T), lambda i: (i, 0, 0)),   # attention (lane-dense, T last)
            ],
        )
        return pl.pallas_call(
            _bahdanau_kernel,
            grid_spec=grid_spec,
            out_shape=(
                jax.ShapeDtypeStruct((B, NT, F), out_dtype),
                jax.ShapeDtypeStruct((B, NT, T), out_dtype),
            ),
            compiler_params=pltpu.CompilerParams(
                dimension_semantics=("parallel",),
                vmem_limit_bytes=budget),
            cost_estimate=pl.CostEstimate(
                flops=flops,
                transcendentals=transcendentals,
                bytes_accessed=bytes_accessed),
        )(hidden_states, values, w1, b1, w2, b2, v)

    if single_buffer_weights:
        try:
            ctx, attn_t = run(True)
        except Exception:            # older jax without Buffered(1) support -> double-buffer
            ctx, attn_t = run(False)
    else:
        ctx, attn_t = run(False)

    # Kernel emits attention lane-dense as (B, NT, T); restore the PyTorch (B, T, NT) contract.
    return ctx, jnp.swapaxes(attn_t, 1, 2)


def init_params(key, in_features, hidden_units, num_task, dtype=jnp.float32):
    """Deterministic init mirroring nn.Linear (uniform +-1/sqrt(fan_in)).
    Weights are stored pre-transposed: w1/w2 are (F, H), v is (H, num_task)."""
    k1, k2, k3, k4, k5, k6 = jax.random.split(key, 6)
    lim1 = 1.0 / (in_features ** 0.5)
    lim2 = 1.0 / (hidden_units ** 0.5)
    return {
        "w1": jax.random.uniform(k1, (in_features, hidden_units), dtype, -lim1, lim1),
        "b1": jax.random.uniform(k2, (1, hidden_units), dtype, -lim1, lim1),
        "w2": jax.random.uniform(k3, (in_features, hidden_units), dtype, -lim1, lim1),
        "b2": jax.random.uniform(k4, (1, hidden_units), dtype, -lim1, lim1),
        "v":  jax.random.uniform(k5, (hidden_units, num_task), dtype, -lim2, lim2),
        "bv": jax.random.uniform(k6, (1, num_task), dtype, -lim2, lim2),
    }


def _reference(hidden_states, values, params):
    """Pure-JAX reference of the PyTorch forward (includes V's bias)."""
    h = hidden_states[:, None, :]                                  # (B, 1, F)
    s = jnp.tanh(values @ params["w1"] + params["b1"]
                 + h @ params["w2"] + params["b2"])                # (B, T, H)
    score = s @ params["v"] + params["bv"]                         # (B, T, NT)
    attn = jax.nn.softmax(score, axis=1)                           # softmax over T
    ctx = jnp.swapaxes(jnp.swapaxes(values, 1, 2) @ attn, 1, 2)    # (B, NT, F)
    return ctx, attn


if __name__ == "__main__":
    B, T, F, H, NT = 2, 8, 32, 32, 4
    key = jax.random.PRNGKey(0)
    kp, kh, kv = jax.random.split(key, 3)

    params = init_params(kp, F, H, NT)
    hidden_states = jax.random.normal(kh, (B, F), jnp.float32)
    values = jax.random.normal(kv, (B, T, F), jnp.float32)

    ctx_ref, attn_ref = _reference(hidden_states, values, params)

    # Exact-math path (f32 MXU operands): tight tolerance vs. the reference.
    ctx32, attn32 = bahdanau_attention(hidden_states, values, params,
                                       mxu_dtype=jnp.float32)
    jax.block_until_ready((ctx32, attn32))
    assert ctx32.shape == (B, NT, F) and attn32.shape == (B, T, NT)
    assert jnp.allclose(ctx32, ctx_ref, atol=1e-4, rtol=1e-4)
    assert jnp.allclose(attn32, attn_ref, atol=1e-4, rtol=1e-4)

    # Production path (bf16 MXU operands, f32 accumulation / elementwise).
    ctx16, attn16 = bahdanau_attention(hidden_states, values, params)
    jax.block_until_ready((ctx16, attn16))
    assert ctx16.shape == (B, NT, F) and attn16.shape == (B, T, NT)
    assert jnp.allclose(ctx16, ctx_ref, atol=5e-2, rtol=5e-2)
    assert jnp.allclose(attn16, attn_ref, atol=5e-2, rtol=5e-2)

    print("KERNEL_OK")
</pallas_src>

<mosaic_0001>
module attributes {stable_mosaic.version = 11 : i64} {
  func.func @_bahdanau_kernel(%arg0: i32, %arg1: memref<2x32xf32, #tpu.memory_space<vmem>>, %arg2: memref<2x8x32xf32, #tpu.memory_space<vmem>>, %arg3: memref<32x32xf32, #tpu.memory_space<vmem>>, %arg4: memref<1x32xf32, #tpu.memory_space<vmem>>, %arg5: memref<32x32xf32, #tpu.memory_space<vmem>>, %arg6: memref<1x32xf32, #tpu.memory_space<vmem>>, %arg7: memref<32x4xf32, #tpu.memory_space<vmem>>, %arg8: memref<2x4x32xf32, #tpu.memory_space<vmem>>, %arg9: memref<2x4x8xf32, #tpu.memory_space<vmem>>) attributes {dimension_semantics = [#tpu.dimension_semantics<parallel>], iteration_bounds = array<i64: 1>, scalar_prefetch = 0 : i64, scratch_operands = 0 : i64, tpu.core_type = #tpu.core_type<tc>, window_params = [{transform_indices = @transform_0, window_bounds = array<i64: 2, 32>}, {transform_indices = @transform_1, window_bounds = array<i64: 2, 8, 32>}, {pipeline_mode = #tpu.pipeline_mode<synchronous>, transform_indices = @transform_2, window_bounds = array<i64: 32, 32>}, {pipeline_mode = #tpu.pipeline_mode<synchronous>, transform_indices = @transform_3, window_bounds = array<i64: 1, 32>}, {pipeline_mode = #tpu.pipeline_mode<synchronous>, transform_indices = @transform_4, window_bounds = array<i64: 32, 32>}, {pipeline_mode = #tpu.pipeline_mode<synchronous>, transform_indices = @transform_5, window_bounds = array<i64: 1, 32>}, {pipeline_mode = #tpu.pipeline_mode<synchronous>, transform_indices = @transform_6, window_bounds = array<i64: 32, 4>}, {transform_indices = @transform_7, window_bounds = array<i64: 2, 4, 32>}, {transform_indices = @transform_8, window_bounds = array<i64: 2, 4, 8>}]} {
    %c0 = arith.constant 0 : index
    %c0_0 = arith.constant 0 : index
    %c0_1 = arith.constant 0 : index
    %0 = vector.load %arg2[%c0, %c0_0, %c0_1] : memref<2x8x32xf32, #tpu.memory_space<vmem>>, vector<2x8x32xf32>
    %c0_2 = arith.constant 0 : index
    %c0_3 = arith.constant 0 : index
    %1 = vector.load %arg1[%c0_2, %c0_3] : memref<2x32xf32, #tpu.memory_space<vmem>>, vector<2x32xf32>
    %2 = vector.shape_cast %0 : vector<2x8x32xf32> to vector<16x32xf32>
    %c0_4 = arith.constant 0 : index
    %c0_5 = arith.constant 0 : index
    %3 = vector.load %arg3[%c0_4, %c0_5] : memref<32x32xf32, #tpu.memory_space<vmem>>, vector<32x32xf32>
    %cst = arith.constant dense<0.000000e+00> : vector<16x32xf32>
    %4 = tpu.matmul %2, %3, %cst {dimension_numbers = #tpu.dot_dimension_numbers<[1], [0], [0], [1], [0, 0, 1, 1], [], []>} : vector<16x32xf32>, vector<32x32xf32>, vector<16x32xf32> -> vector<16x32xf32>
    %c0_6 = arith.constant 0 : index
    %c0_7 = arith.constant 0 : index
    %5 = vector.load %arg5[%c0_6, %c0_7] : memref<32x32xf32, #tpu.memory_space<vmem>>, vector<32x32xf32>
    %cst_8 = arith.constant dense<0.000000e+00> : vector<2x32xf32>
    %6 = tpu.matmul %1, %5, %cst_8 {dimension_numbers = #tpu.dot_dimension_numbers<[1], [0], [0], [1], [0, 0, 1, 1], [], []>} : vector<2x32xf32>, vector<32x32xf32>, vector<2x32xf32> -> vector<2x32xf32>
    %c0_9 = arith.constant 0 : index
    %c0_10 = arith.constant 0 : index
    %7 = vector.load %arg4[%c0_9, %c0_10] : memref<1x32xf32, #tpu.memory_space<vmem>>, vector<1x32xf32>
    %8 = vector.broadcast %7 : vector<1x32xf32> to vector<2x32xf32>
    %9 = arith.addf %6, %8 : vector<2x32xf32>
    %c0_11 = arith.constant 0 : index
    %c0_12 = arith.constant 0 : index
    %10 = vector.load %arg6[%c0_11, %c0_12] : memref<1x32xf32, #tpu.memory_space<vmem>>, vector<1x32xf32>
    %11 = vector.broadcast %10 : vector<1x32xf32> to vector<2x32xf32>
    %12 = arith.addf %9, %11 : vector<2x32xf32>
    %13 = vector.shape_cast %4 : vector<16x32xf32> to vector<2x8x32xf32>
    %14 = vector.shape_cast %12 : vector<2x32xf32> to vector<2x1x32xf32>
    %15 = vector.broadcast %14 : vector<2x1x32xf32> to vector<2x8x32xf32>
    %16 = arith.addf %13, %15 : vector<2x8x32xf32>
    %17 = math.tanh %16 : vector<2x8x32xf32>
    %18 = vector.shape_cast %17 : vector<2x8x32xf32> to vector<16x32xf32>
    %c0_13 = arith.constant 0 : index
    %c0_14 = arith.constant 0 : index
    %19 = vector.load %arg7[%c0_13, %c0_14] : memref<32x4xf32, #tpu.memory_space<vmem>>, vector<32x4xf32>
    %cst_15 = arith.constant dense<0.000000e+00> : vector<16x4xf32>
    %20 = tpu.matmul %18, %19, %cst_15 {dimension_numbers = #tpu.dot_dimension_numbers<[1], [0], [0], [1], [0, 0, 1, 1], [], []>} : vector<16x32xf32>, vector<32x4xf32>, vector<16x4xf32> -> vector<16x4xf32>
    %21 = vector.shape_cast %20 : vector<16x4xf32> to vector<2x8x4xf32>
    %22 = tpu.transpose %21, [0, 2, 1] : vector<2x8x4xf32> -> vector<2x4x8xf32>
    %cst_16 = arith.constant dense<0xFF800000> : vector<2x4xf32>
    %23 = vector.multi_reduction <maximumf>, %22, %cst_16 [2] : vector<2x4x8xf32> to vector<2x4xf32>
    %24 = vector.shape_cast %23 : vector<2x4xf32> to vector<2x4x1xf32>
    %25 = vector.broadcast %24 : vector<2x4x1xf32> to vector<2x4x8xf32>
    %26 = arith.subf %22, %25 : vector<2x4x8xf32>
    %27 = math.exp %26 : vector<2x4x8xf32>
    %cst_17 = arith.constant dense<0.000000e+00> : vector<2x4xf32>
    %28 = vector.multi_reduction <add>, %27, %cst_17 [2] : vector<2x4x8xf32> to vector<2x4xf32>
    %29 = vector.shape_cast %28 : vector<2x4xf32> to vector<2x4x1xf32>
    %30 = tpu.reciprocal %29 {approx = true} : vector<2x4x1xf32> -> vector<2x4x1xf32>
    %31 = arith.mulf %29, %30 : vector<2x4x1xf32>
    %cst_18 = arith.constant 2.000000e+00 : f32
    %32 = vector.broadcast %cst_18 : f32 to vector<2x4x1xf32>
    %33 = arith.subf %32, %31 : vector<2x4x1xf32>
    %34 = arith.mulf %30, %33 : vector<2x4x1xf32>
    %35 = vector.broadcast %34 : vector<2x4x1xf32> to vector<2x4x8xf32>
    %36 = arith.mulf %27, %35 : vector<2x4x8xf32>
    %c0_19 = arith.constant 0 : index
    %c0_20 = arith.constant 0 : index
    %c0_21 = arith.constant 0 : index
    %37 = vector.load %arg9[%c0_19, %c0_20, %c0_21] : memref<2x4x8xf32, #tpu.memory_space<vmem>>, vector<2x4x8xf32>
    tpu.vector_store %arg9[%c0_19, %c0_20, %c0_21], %36 {strides = array<i32>} : memref<2x4x8xf32, #tpu.memory_space<vmem>>, vector<2x4x8xf32>,
    %cst_22 = arith.constant dense<0.000000e+00> : vector<2x4x32xf32>
    %38 = tpu.matmul %36, %0, %cst_22 {dimension_numbers = #tpu.dot_dimension_numbers<[2], [1], [1], [2], [0, 0, 0, 1, 1, 2], [0], [0]>} : vector<2x4x8xf32>, vector<2x8x32xf32>, vector<2x4x32xf32> -> vector<2x4x32xf32>
    %c0_23 = arith.constant 0 : index
    %c0_24 = arith.constant 0 : index
    %c0_25 = arith.constant 0 : index
    %39 = vector.load %arg8[%c0_23, %c0_24, %c0_25] : memref<2x4x32xf32, #tpu.memory_space<vmem>>, vector<2x4x32xf32>
    tpu.vector_store %arg8[%c0_23, %c0_24, %c0_25], %38 {strides = array<i32>} : memref<2x4x32xf32, #tpu.memory_space<vmem>>, vector<2x4x32xf32>,
    return
  }
  func.func @transform_0(%arg0: i32) -> (i32, i32) {
    %c0_i32 = arith.constant 0 : i32
    %c0_i32_0 = arith.constant 0 : i32
    return %arg0, %c0_i32 : i32, i32
  }
  func.func @transform_1(%arg0: i32) -> (i32, i32, i32) {
    %c0_i32 = arith.constant 0 : i32
    %c0_i32_0 = arith.constant 0 : i32
    %c0_i32_1 = arith.constant 0 : i32
    return %arg0, %c0_i32, %c0_i32_0 : i32, i32, i32
  }
  func.func @transform_2(%arg0: i32) -> (i32, i32) {
    %c0_i32 = arith.constant 0 : i32
    %c0_i32_0 = arith.constant 0 : i32
    %c0_i32_1 = arith.constant 0 : i32
    return %c0_i32, %c0_i32_0 : i32, i32
  }
  func.func @transform_3(%arg0: i32) -> (i32, i32) {
    %c0_i32 = arith.constant 0 : i32
    %c0_i32_0 = arith.constant 0 : i32
    %c0_i32_1 = arith.constant 0 : i32
    return %c0_i32, %c0_i32_0 : i32, i32
  }
  func.func @transform_4(%arg0: i32) -> (i32, i32) {
    %c0_i32 = arith.constant 0 : i32
    %c0_i32_0 = arith.constant 0 : i32
    %c0_i32_1 = arith.constant 0 : i32
    return %c0_i32, %c0_i32_0 : i32, i32
  }
  func.func @transform_5(%arg0: i32) -> (i32, i32) {
    %c0_i32 = arith.constant 0 : i32
    %c0_i32_0 = arith.constant 0 : i32
    %c0_i32_1 = arith.constant 0 : i32
    return %c0_i32, %c0_i32_0 : i32, i32
  }
  func.func @transform_6(%arg0: i32) -> (i32, i32) {
    %c0_i32 = arith.constant 0 : i32
    %c0_i32_0 = arith.constant 0 : i32
    %c0_i32_1 = arith.constant 0 : i32
    return %c0_i32, %c0_i32_0 : i32, i32
  }
  func.func @transform_7(%arg0: i32) -> (i32, i32, i32) {
    %c0_i32 = arith.constant 0 : i32
    %c0_i32_0 = arith.constant 0 : i32
    %c0_i32_1 = arith.constant 0 : i32
    return %arg0, %c0_i32, %c0_i32_0 : i32, i32, i32
  }
  func.func @transform_8(%arg0: i32) -> (i32, i32, i32) {
    %c0_i32 = arith.constant 0 : i32
    %c0_i32_0 = arith.constant 0 : i32
    %c0_i32_1 = arith.constant 0 : i32
    return %arg0, %c0_i32, %c0_i32_0 : i32, i32, i32
  }
}

module attributes {stable_mosaic.version = 11 : i64} {
  func.func @_bahdanau_kernel(%arg0: i32, %arg1: memref<2x32xf32, #tpu.memory_space<vmem>>, %arg2: memref<2x8x32xf32, #tpu.memory_space<vmem>>, %arg3: memref<32x32xf32, #tpu.memory_space<vmem>>, %arg4: memref<1x32xf32, #tpu.memory_space<vmem>>, %arg5: memref<32x32xf32, #tpu.memory_space<vmem>>, %arg6: memref<1x32xf32, #tpu.memory_space<vmem>>, %arg7: memref<32x4xf32, #tpu.memory_space<vmem>>, %arg8: memref<2x4x32xf32, #tpu.memory_space<vmem>>, %arg9: memref<2x4x8xf32, #tpu.memory_space<vmem>>) attributes {dimension_semantics = [#tpu.dimension_semantics<parallel>], iteration_bounds = array<i64: 1>, scalar_prefetch = 0 : i64, scratch_operands = 0 : i64, tpu.core_type = #tpu.core_type<tc>, window_params = [{transform_indices = @transform_0, window_bounds = array<i64: 2, 32>}, {transform_indices = @transform_1, window_bounds = array<i64: 2, 8, 32>}, {pipeline_mode = #tpu.pipeline_mode<synchronous>, transform_indices = @transform_2, window_bounds = array<i64: 32, 32>}, {pipeline_mode = #tpu.pipeline_mode<synchronous>, transform_indices = @transform_3, window_bounds = array<i64: 1, 32>}, {pipeline_mode = #tpu.pipeline_mode<synchronous>, transform_indices = @transform_4, window_bounds = array<i64: 32, 32>}, {pipeline_mode = #tpu.pipeline_mode<synchronous>, transform_indices = @transform_5, window_bounds = array<i64: 1, 32>}, {pipeline_mode = #tpu.pipeline_mode<synchronous>, transform_indices = @transform_6, window_bounds = array<i64: 32, 4>}, {transform_indices = @transform_7, window_bounds = array<i64: 2, 4, 32>}, {transform_indices = @transform_8, window_bounds = array<i64: 2, 4, 8>}]} {
    %c0 = arith.constant 0 : index
    %c0_0 = arith.constant 0 : index
    %c0_1 = arith.constant 0 : index
    %0 = vector.load %arg2[%c0, %c0_0, %c0_1] : memref<2x8x32xf32, #tpu.memory_space<vmem>>, vector<2x8x32xf32>
    %c0_2 = arith.constant 0 : index
    %c0_3 = arith.constant 0 : index
    %1 = vector.load %arg1[%c0_2, %c0_3] : memref<2x32xf32, #tpu.memory_space<vmem>>, vector<2x32xf32>
    %2 = vector.shape_cast %0 : vector<2x8x32xf32> to vector<16x32xf32>
    %c0_4 = arith.constant 0 : index
    %c0_5 = arith.constant 0 : index
    %3 = vector.load %arg3[%c0_4, %c0_5] : memref<32x32xf32, #tpu.memory_space<vmem>>, vector<32x32xf32>
    %cst = arith.constant dense<0.000000e+00> : vector<16x32xf32>
    %4 = tpu.matmul %2, %3, %cst {dimension_numbers = #tpu.dot_dimension_numbers<[1], [0], [0], [1], [0, 0, 1, 1], [], []>} : vector<16x32xf32>, vector<32x32xf32>, vector<16x32xf32> -> vector<16x32xf32>
    %c0_6 = arith.constant 0 : index
    %c0_7 = arith.constant 0 : index
    %5 = vector.load %arg5[%c0_6, %c0_7] : memref<32x32xf32, #tpu.memory_space<vmem>>, vector<32x32xf32>
    %cst_8 = arith.constant dense<0.000000e+00> : vector<2x32xf32>
    %6 = tpu.matmul %1, %5, %cst_8 {dimension_numbers = #tpu.dot_dimension_numbers<[1], [0], [0], [1], [0, 0, 1, 1], [], []>} : vector<2x32xf32>, vector<32x32xf32>, vector<2x32xf32> -> vector<2x32xf32>
    %c0_9 = arith.constant 0 : index
    %c0_10 = arith.constant 0 : index
    %7 = vector.load %arg4[%c0_9, %c0_10] : memref<1x32xf32, #tpu.memory_space<vmem>>, vector<1x32xf32>
    %8 = vector.broadcast %7 : vector<1x32xf32> to vector<2x32xf32>
    %9 = arith.addf %6, %8 : vector<2x32xf32>
    %c0_11 = arith.constant 0 : index
    %c0_12 = arith.constant 0 : index
    %10 = vector.load %arg6[%c0_11, %c0_12] : memref<1x32xf32, #tpu.memory_space<vmem>>, vector<1x32xf32>
    %11 = vector.broadcast %10 : vector<1x32xf32> to vector<2x32xf32>
    %12 = arith.addf %9, %11 : vector<2x32xf32>
    %13 = vector.shape_cast %4 : vector<16x32xf32> to vector<2x8x32xf32>
    %14 = vector.shape_cast %12 : vector<2x32xf32> to vector<2x1x32xf32>
    %15 = vector.broadcast %14 : vector<2x1x32xf32> to vector<2x8x32xf32>
    %16 = arith.addf %13, %15 : vector<2x8x32xf32>
    %17 = math.tanh %16 : vector<2x8x32xf32>
    %18 = vector.shape_cast %17 : vector<2x8x32xf32> to vector<16x32xf32>
    %c0_13 = arith.constant 0 : index
    %c0_14 = arith.constant 0 : index
    %19 = vector.load %arg7[%c0_13, %c0_14] : memref<32x4xf32, #tpu.memory_space<vmem>>, vector<32x4xf32>
    %cst_15 = arith.constant dense<0.000000e+00> : vector<16x4xf32>
    %20 = tpu.matmul %18, %19, %cst_15 {dimension_numbers = #tpu.dot_dimension_numbers<[1], [0], [0], [1], [0, 0, 1, 1], [], []>} : vector<16x32xf32>, vector<32x4xf32>, vector<16x4xf32> -> vector<16x4xf32>
    %21 = vector.shape_cast %20 : vector<16x4xf32> to vector<2x8x4xf32>
    %22 = tpu.transpose %21, [0, 2, 1] : vector<2x8x4xf32> -> vector<2x4x8xf32>
    %cst_16 = arith.constant dense<0xFF800000> : vector<2x4xf32>
    %23 = vector.multi_reduction <maximumf>, %22, %cst_16 [2] : vector<2x4x8xf32> to vector<2x4xf32>
    %24 = vector.shape_cast %23 : vector<2x4xf32> to vector<2x4x1xf32>
    %25 = vector.broadcast %24 : vector<2x4x1xf32> to vector<2x4x8xf32>
    %26 = arith.subf %22, %25 : vector<2x4x8xf32>
    %27 = math.exp %26 : vector<2x4x8xf32>
    %cst_17 = arith.constant dense<0.000000e+00> : vector<2x4xf32>
    %28 = vector.multi_reduction <add>, %27, %cst_17 [2] : vector<2x4x8xf32> to vector<2x4xf32>
    %29 = vector.shape_cast %28 : vector<2x4xf32> to vector<2x4x1xf32>
    %30 = tpu.reciprocal %29 {approx = true} : vector<2x4x1xf32> -> vector<2x4x1xf32>
    %31 = arith.mulf %29, %30 : vector<2x4x1xf32>
    %cst_18 = arith.constant 2.000000e+00 : f32
    %32 = vector.broadcast %cst_18 : f32 to vector<2x4x1xf32>
    %33 = arith.subf %32, %31 : vector<2x4x1xf32>
    %34 = arith.mulf %30, %33 : vector<2x4x1xf32>
    %35 = vector.broadcast %34 : vector<2x4x1xf32> to vector<2x4x8xf32>
    %36 = arith.mulf %27, %35 : vector<2x4x8xf32>
    %c0_19 = arith.constant 0 : index
    %c0_20 = arith.constant 0 : index
    %c0_21 = arith.constant 0 : index
    %37 = vector.load %arg9[%c0_19, %c0_20, %c0_21] : memref<2x4x8xf32, #tpu.memory_space<vmem>>, vector<2x4x8xf32>
    tpu.vector_store %arg9[%c0_19, %c0_20, %c0_21], %36 {strides = array<i32>} : memref<2x4x8xf32, #tpu.memory_space<vmem>>, vector<2x4x8xf32>,
    %cst_22 = arith.constant dense<0.000000e+00> : vector<2x4x32xf32>
    %38 = tpu.matmul %36, %0, %cst_22 {dimension_numbers = #tpu.dot_dimension_numbers<[2], [1], [1], [2], [0, 0, 0, 1, 1, 2], [0], [0]>} : vector<2x4x8xf32>, vector<2x8x32xf32>, vector<2x4x32xf32> -> vector<2x4x32xf32>
    %c0_23 = arith.constant 0 : index
    %c0_24 = arith.constant 0 : index
    %c0_25 = arith.constant 0 : index
    %39 = vector.load %arg8[%c0_23, %c0_24, %c0_25] : memref<2x4x32xf32, #tpu.memory_space<vmem>>, vector<2x4x32xf32>
    tpu.vector_store %arg8[%c0_23, %c0_24, %c0_25], %38 {strides = array<i32>} : memref<2x4x32xf32, #tpu.memory_space<vmem>>, vector<2x4x32xf32>,
    return
  }
  func.func @transform_0(%arg0: i32) -> (i32, i32) {
    %c0_i32 = arith.constant 0 : i32
    %c0_i32_0 = arith.constant 0 : i32
    return %arg0, %c0_i32 : i32, i32
  }
  func.func @transform_1(%arg0: i32) -> (i32, i32, i32) {
    %c0_i32 = arith.constant 0 : i32
    %c0_i32_0 = arith.constant 0 : i32
    %c0_i32_1 = arith.constant 0 : i32
    return %arg0, %c0_i32, %c0_i32_0 : i32, i32, i32
  }
  func.func @transform_2(%arg0: i32) -> (i32, i32) {
    %c0_i32 = arith.constant 0 : i32
    %c0_i32_0 = arith.constant 0 : i32
    %c0_i32_1 = arith.constant 0 : i32
    return %c0_i32, %c0_i32_0 : i32, i32
  }
  func.func @transform_3(%arg0: i32) -> (i32, i32) {
    %c0_i32 = arith.constant 0 : i32
    %c0_i32_0 = arith.constant 0 : i32
    %c0_i32_1 = arith.constant 0 : i32
    return %c0_i32, %c0_i32_0 : i32, i32
  }
  func.func @transform_4(%arg0: i32) -> (i32, i32) {
    %c0_i32 = arith.constant 0 : i32
    %c0_i32_0 = arith.constant 0 : i32
    %c0_i32_1 = arith.constant 0 : i32
    return %c0_i32, %c0_i32_0 : i32, i32
  }
  func.func @transform_5(%arg0: i32) -> (i32, i32) {
    %c0_i32 = arith.constant 0 : i32
    %c0_i32_0 = arith.constant 0 : i32
    %c0_i32_1 = arith.constant 0 : i32
    return %c0_i32, %c0_i32_0 : i32, i32
  }
  func.func @transform_6(%arg0: i32) -> (i32, i32) {
    %c0_i32 = arith.constant 0 : i32
    %c0_i32_0 = arith.constant 0 : i32
    %c0_i32_1 = arith.constant 0 : i32
    return %c0_i32, %c0_i32_0 : i32, i32
  }
  func.func @transform_7(%arg0: i32) -> (i32, i32, i32) {
    %c0_i32 = arith.constant 0 : i32
    %c0_i32_0 = arith.constant 0 : i32
    %c0_i32_1 = arith.constant 0 : i32
    return %arg0, %c0_i32, %c0_i32_0 : i32, i32, i32
  }
  func.func @transform_8(%arg0: i32) -> (i32, i32, i32) {
    %c0_i32 = arith.constant 0 : i32
    %c0_i32_0 = arith.constant 0 : i32
    %c0_i32_1 = arith.constant 0 : i32
    return %arg0, %c0_i32, %c0_i32_0 : i32, i32, i32
  }
}

</mosaic_0001>

<bundles_post_ra>
// kernel: tpu_custom_call.1
= control target key start
LH: loop header
LB: loop body
LE: loop exit
PB: predicated region body
PF: predicated region fallthrough
CT: control target
= control target key end

     0   :  { %14 = vsyncpa [#allocation3], 0  ;;  %s1242_s0 = inlined_call_operand.hbm [shape: f32[2,32], index: 0, kind: input, shape index: {}]   ;;  %s1243_s1 = inlined_call_operand.hbm [shape: f32[2,8,32], index: 1, kind: input, shape index: {}]   ;;  %s1244_s2 = inlined_call_operand.hbm [shape: f32[32,32], index: 2, kind: input, shape index: {}]   ;;  %s1245_s3 = inlined_call_operand.hbm [shape: f32[1,32], index: 3, kind: input, shape index: {}]   ;;  %s1246_s4 = inlined_call_operand.hbm [shape: f32[32,32], index: 4, kind: input, shape index: {}]   ;;  %s1247_s5 = inlined_call_operand.hbm [shape: f32[1,32], index: 5, kind: input, shape index: {}]   ;;  %s1248_s6 = inlined_call_operand.hbm [shape: f32[32,4], index: 6, kind: input, shape index: {}]   ;;  %s1249_s7 = inlined_call_operand.hbm [shape: f32[2,4,32], index: 7, kind: output, shape index: {0}]   ;;  %s1250_s8 = inlined_call_operand.hbm [shape: f32[2,4,8], index: 8, kind: output, shape index: {1}]  }
   0x1   :  { %15 = vsyncpa [#allocation6], 0 }
   0x2   :  { %16 = vsyncpa [#allocation9], 0 }
   0x3   :  { %17 = vsyncpa [#allocation12], 0 }
   0x4   :  { %18 = vsyncpa [#allocation4], 0 }
   0x5   :  { %19 = vsyncpa [#allocation16], 0  ;;  %s1037_s27 = smov [#allocation5]   ;;  %s827_s9 = scalar_lea.hbm %s1243_s1, 256 }
   0x6   :  { %s35_s28 = sshll.u32 %s1037_s27, 4  ;;  %p828_p0 = scmp.ne.s32.totalorder %s1243_s1, %s827_s9  ;;  %s36_s28 = int_to_ptr.vmem [resolvable:$true] %s35_s28 }
   0x7   :  { %p831_p1 = scmp.lt.u32.totalorder %s827_s9, %s1243_s1 }
   0x9   :  { %p833_p2 = pnand %p831_p1, %p828_p0 }
   0xb   :  { %836 = shalt.err (!%p833_p2)
}
   0xc   :  { %s837_s14 = scalar_lea.vmem %s36_s28, 256  ;;  %p842_p4 = scmp.lt.s32.totalorder %s36_s28, %s36_s28 }
   0xd   :  { %p838_p3 = scmp.ne.s32.totalorder %s36_s28, %s837_s14  ;;  %p843_p5 = scmp.lt.s32.totalorder %s837_s14, %s837_s14 }
   0xf   :  { %p844_p6 = por %p843_p5, %p842_p4 }
  0x11   :  { %p845_p7 = pnand %p844_p6, %p838_p3 }
  0x13   :  { %848 = shalt.err (!%p845_p7)
}
  0x14   :  { %s1038_s15 = smov 128   ;;  %s1039_s16 = smov 8  }
  0x15   :  { %41 = dma.hbm_to_vmem [thread:$0]  %s1243_s1, 256, %s36_s28, [#allocation6], %s1038_s15, %s1038_s15, %s1039_s16  }
  0x16   :  { %s1040_s19 = smov [#allocation8]   ;;  %s1041_s21 = smov [#allocation11]  }
  0x17   :  { %s60_s20 = sshll.u32 %s1040_s19, 4  ;;  %s82_s22 = sshll.u32 %s1041_s21, 4  ;;  %s61_s20 = int_to_ptr.vmem [resolvable:$true] %s60_s20  ;;  %s83_s22 = int_to_ptr.vmem [resolvable:$true] %s82_s22 }
  0x18   :  { %s849_s25 = scalar_lea.hbm %s1245_s3, 16 }
  0x19   :  { %p850_p8 = scmp.ne.s32.totalorder %s1245_s3, %s849_s25  ;;  %p853_p9 = scmp.lt.u32.totalorder %s849_s25, %s1245_s3 }
  0x1b   :  { %p855_p10 = pnand %p853_p9, %p850_p8 }
  0x1d   :  { %858 = shalt.err (!%p855_p10)
}
  0x1e   :  { %s859_s1 = scalar_lea.vmem %s61_s20, 16  ;;  %s863_s28 = scalar_lea.vmem %s61_s20, 32 }
  0x1f   :  { %p860_p11 = scmp.ne.s32.totalorder %s61_s20, %s859_s1  ;;  %p864_p12 = scmp.lt.s32.totalorder %s61_s20, %s61_s20 }
  0x20   :  { %p865_p13 = scmp.lt.s32.totalorder %s863_s28, %s859_s1 }
  0x22   :  { %p866_p0 = por %p865_p13, %p864_p12 }
  0x24   :  { %p867_p1 = pnand %p866_p0, %p860_p11 }
  0x26   :  { %870 = shalt.err (!%p867_p1)
}
  0x27   :  { %63 = dma.hbm_to_vmem [thread:$0]  %s1245_s3, 16, %s61_s20, [#allocation9]  }
  0x28   :  { %s871_s13 = scalar_lea.hbm %s1247_s5, 16 }
  0x29   :  { %p872_p2 = scmp.ne.s32.totalorder %s1247_s5, %s871_s13  ;;  %p875_p3 = scmp.lt.u32.totalorder %s871_s13, %s1247_s5 }
  0x2b   :  { %p877_p4 = pnand %p875_p3, %p872_p2 }
  0x2d   :  { %880 = shalt.err (!%p877_p4)
}
  0x2e   :  { %s881_s21 = scalar_lea.vmem %s83_s22, 16  ;;  %s885_s23 = scalar_lea.vmem %s83_s22, 32 }
  0x2f   :  { %p882_p5 = scmp.ne.s32.totalorder %s83_s22, %s881_s21  ;;  %p886_p6 = scmp.lt.s32.totalorder %s83_s22, %s83_s22 }
  0x30   :  { %p887_p7 = scmp.lt.s32.totalorder %s885_s23, %s881_s21 }
  0x32   :  { %p888_p8 = por %p887_p7, %p886_p6 }
  0x34   :  { %p889_p9 = pnand %p888_p8, %p882_p5 }
  0x36   :  { %892 = shalt.err (!%p889_p9)
}
  0x37   :  { %85 = dma.hbm_to_vmem [thread:$0]  %s1247_s5, 16, %s83_s22, [#allocation12]  }
  0x38   :  { %s1042_s24 = smov [#allocation2]   ;;  %s1043_s26 = smov [#allocation7]  }
  0x39   :  { %s26_s25 = sshll.u32 %s1042_s24, 4  ;;  %s47_s27 = sshll.u32 %s1043_s26, 4  ;;  %s27_s25 = int_to_ptr.vmem [resolvable:$true] %s26_s25  ;;  %s48_s27 = int_to_ptr.vmem [resolvable:$true] %s47_s27 }
  0x3a   :  { %s893_s1 = scalar_lea.hbm %s1242_s0, 32 }
  0x3b   :  { %p894_p10 = scmp.ne.s32.totalorder %s1242_s0, %s893_s1  ;;  %p897_p11 = scmp.lt.u32.totalorder %s893_s1, %s1242_s0 }
  0x3d   :  { %p899_p12 = pnand %p897_p11, %p894_p10 }
  0x3f   :  { %902 = shalt.err (!%p899_p12)
}
  0x40   :  { %s903_s5 = scalar_lea.vmem %s27_s25, 32  ;;  %p908_p0 = scmp.lt.s32.totalorder %s27_s25, %s27_s25 }
  0x41   :  { %p904_p13 = scmp.ne.s32.totalorder %s27_s25, %s903_s5  ;;  %p909_p1 = scmp.lt.s32.totalorder %s903_s5, %s903_s5 }
  0x43   :  { %p910_p2 = por %p909_p1, %p908_p0 }
  0x45   :  { %p911_p3 = pnand %p910_p2, %p904_p13 }
  0x47   :  { %914 = shalt.err (!%p911_p3)
}
  0x48   :  { %29 = dma.hbm_to_vmem [thread:$0]  %s1242_s0, 32, %s27_s25, [#allocation3]  }
  0x49   :  { %s915_s17 = scalar_lea.hbm %s1244_s2, 512 }
  0x4a   :  { %p916_p4 = scmp.ne.s32.totalorder %s1244_s2, %s915_s17  ;;  %p919_p5 = scmp.lt.u32.totalorder %s915_s17, %s1244_s2 }
  0x4c   :  { %p921_p6 = pnand %p919_p5, %p916_p4 }
  0x4e   :  { %924 = shalt.err (!%p921_p6)
}
  0x4f   :  { %s925_s3 = scalar_lea.vmem %s48_s27, 512  ;;  %p930_p8 = scmp.lt.s32.totalorder %s48_s27, %s48_s27 }
  0x50   :  { %p926_p7 = scmp.ne.s32.totalorder %s48_s27, %s925_s3  ;;  %p931_p9 = scmp.lt.s32.totalorder %s925_s3, %s925_s3 }
  0x52   :  { %p932_p10 = por %p931_p9, %p930_p8 }
  0x54   :  { %p933_p11 = pnand %p932_p10, %p926_p7 }
  0x56   :  { %936 = shalt.err (!%p933_p11)
}
  0x57   :  { %53 = dma.hbm_to_vmem [thread:$0]  %s1244_s2, 512, %s48_s27, [#allocation6], %s1038_s15, %s1038_s15, %s1039_s16  }
  0x58   :  { %s1044_s24 = smov [#allocation10]   ;;  %s1045_s26 = smov [#allocation13]  }
  0x59   :  { %s69_s25 = sshll.u32 %s1044_s24, 4  ;;  %s91_s29 = sshll.u32 %s1045_s26, 4  ;;  %s70_s25 = int_to_ptr.vmem [resolvable:$true] %s69_s25  ;;  %s92_s29 = int_to_ptr.vmem [resolvable:$true] %s91_s29 }
  0x5a   :  { %s937_s28 = scalar_lea.hbm %s1246_s4, 512 }
  0x5b   :  { %p938_p12 = scmp.ne.s32.totalorder %s1246_s4, %s937_s28  ;;  %p941_p13 = scmp.lt.u32.totalorder %s937_s28, %s1246_s4 }
  0x5d   :  { %p943_p0 = pnand %p941_p13, %p938_p12 }
  0x5f   :  { %946 = shalt.err (!%p943_p0)
}
  0x60   :  { %s947_s2 = scalar_lea.vmem %s70_s25, 512  ;;  %p952_p2 = scmp.lt.s32.totalorder %s70_s25, %s70_s25 }
  0x61   :  { %p948_p1 = scmp.ne.s32.totalorder %s70_s25, %s947_s2  ;;  %p953_p3 = scmp.lt.s32.totalorder %s947_s2, %s947_s2 }
  0x63   :  { %p954_p4 = por %p953_p3, %p952_p2 }
  0x65   :  { %p955_p5 = pnand %p954_p4, %p948_p1 }
  0x67   :  { %958 = shalt.err (!%p955_p5)
}
  0x68   :  { %75 = dma.hbm_to_vmem [thread:$0]  %s1246_s4, 512, %s70_s25, [#allocation9], %s1038_s15, %s1038_s15, %s1039_s16  }
  0x69   :  { %s959_s14 = scalar_lea.hbm %s1248_s6, 512 }
  0x6a   :  { %p960_p6 = scmp.ne.s32.totalorder %s1248_s6, %s959_s14  ;;  %p963_p7 = scmp.lt.u32.totalorder %s959_s14, %s1248_s6 }
  0x6c   :  { %p965_p8 = pnand %p963_p7, %p960_p6 }
  0x6e   :  { %968 = shalt.err (!%p965_p8)
}
  0x6f   :  { %s969_s23 = scalar_lea.vmem %s92_s29, 512  ;;  %p974_p10 = scmp.lt.s32.totalorder %s92_s29, %s92_s29 }
  0x70   :  { %p970_p9 = scmp.ne.s32.totalorder %s92_s29, %s969_s23  ;;  %p975_p11 = scmp.lt.s32.totalorder %s969_s23, %s969_s23 }
  0x72   :  { %p976_p12 = por %p975_p11, %p974_p10 }
  0x74   :  { %p977_p13 = pnand %p976_p12, %p970_p9 }
  0x76   :  { %980 = shalt.err (!%p977_p13)
}
  0x77   :  { %97 = dma.hbm_to_vmem [thread:$0]  %s1248_s6, 512, %s92_s29, [#allocation12], %s1038_s15, %s1038_s15, %s1039_s16  }
  0x78   :  { %1025 = dma.done.wait [#allocation3], 32  }
  0x79   :  { %1026 = vsyncadd [#allocation3], 4294967264 }
  0x7a   :  { %1027 = dma.done.wait [#allocation6], 768  }
  0x7b   :  { %1028 = vsyncadd [#allocation6], 4294966528 }
  0x7c   :  { %1029 = dma.done.wait [#allocation9], 528  }
  0x7d   :  { %1030 = vsyncadd [#allocation9], 4294966768 }
  0x7e   :  { %1031 = dma.done.wait [#allocation12], 528  }
  0x7f   :  { %1032 = vsyncadd [#allocation12], 4294966768  ;;  %v1046_v0 = vmov 0.0|0.0   ;;  %vm1047_vm0 = vmmov 0   ;;  %v1048_v1 = vmov 0.0   ;;  %v208_v2 = vld [vmem:[#allocation10] sm:$0xff]  ;;  %v304_v25 = vlaneseq }
  0x80   :  { %784 = vmatprep.subr.bf16.mxu1 %v1046_v0  ;;  %752 = vmatprep.mubr.msk.f32.mxu1 %vm1047_vm0, %v1048_v1  ;;  %v209_v3 = vld [vmem:[#allocation10 + $0x8] sm:$0xff]  ;;  %v210_v4 = vld [vmem:[#allocation10 + $0x10] sm:$0xff]  ;;  %v211_v6 = vld [vmem:[#allocation10 + $0x18] sm:$0xff]  ;;  %vm126_vm1 = vcmask 261120   ;;  %v1049_v23 = vmov 1966171168  }
  0x81   :  { %v785_v5 = vpack.c.bf16 %v209_v3, %v208_v2  ;;  %v122_v7 = vld [vmem:[#allocation7] sm:$0xff]  ;;  %v123_v8 = vld [vmem:[#allocation7 + $0x8] sm:$0xff]  ;;  %v124_v9 = vld [vmem:[#allocation7 + $0x10] sm:$0xff]  ;;  %v788_v11 = vpack.c.bf16 %v211_v6, %v210_v4  ;;  %v302_v24 = vunpack.c.l.s4 %v1049_v23  ;;  %v305_v27 = vshrl.u32 %v304_v25, 7  ;;  %s1050_s6 = smov [#allocation15]  }
  0x82   :  { %v125_v10 = vld [vmem:[#allocation7 + $0x18] sm:$0xff]  ;;  %v776_v12 = vpack.c.bf16 %v123_v8, %v122_v7  ;;  %v119_v14 = vld [vmem:[#allocation5] sm:$0xff]  ;;  %v121_v15 = vld [vmem:[#allocation2] sm:$0x3]  ;;  %vm486_vm2 = vcmask 60416   ;;  %vm517_vm3 = vcmask 64512  }
  0x83   :  { %786 = vmatpush3.bf16.msra.mxu1 %v785_v5  ;;  %v780_v13 = vpack.c.bf16 %v125_v10, %v124_v9  ;;  %741 = vmatprep.mubr.msk.f32.mxu0 %vm126_vm1, %v119_v14  ;;  %v1200_v16 = vld [vmem:[#allocation5 + $0x8] sm:$0xff]  ;;  %v337_v17 = vld [vmem:[#allocation13] sm:$0xff]  ;;  %v338_v18 = vld [vmem:[#allocation13 + $0x8] sm:$0xff]  ;;  %v303_v26 = vunpack.c.0.s8 %v302_v24  ;;  %v325_v38 = vsub.s32 0, %v305_v27  ;;  %s684_s15 = sshll.u32 %s1050_s6, 4  ;;  %s685_s15 = int_to_ptr.vmem [resolvable:$true] %s684_s15 }
  0x84   :  { %787 = vmatprep.subr.bf16.mxu1 %v1046_v0  ;;  %777 = vmatprep.subr.bf16.mxu0 %v776_v12  ;;  %v339_v19 = vld [vmem:[#allocation13 + $0x10] sm:$0xff]  ;;  %v790_v20 = vpack.c.bf16 %v338_v18, %v337_v17  ;;  %v340_v21 = vld [vmem:[#allocation13 + $0x18] sm:$0xff]  ;;  %s981_s16 = scalar_lea.vmem %s685_s15, 128  ;;  %p986_p1 = scmp.lt.s32.totalorder %s685_s15, %s685_s15 }
  0x85   :  { %779 = vmatpush3.bf16.msra.mxu0 %v776_v12  ;;  %v794_v22 = vpack.c.bf16 %v340_v21, %v339_v19  ;;  %v705_v28 = vld [vmem:[#allocation8] ss:$0 sm:$0xff]  ;;  %v707_v30 = vld [vmem:[#allocation11] ss:$0 sm:$0xff]  ;;  %v306_v32 = vsub.s32 %v303_v26, %v305_v27  ;;  %p982_p0 = scmp.ne.s32.totalorder %s685_s15, %s981_s16  ;;  %p987_p2 = scmp.lt.s32.totalorder %s981_s16, %s981_s16 }
  0x86   :  { %781 = vmatprep.subr.bf16.mxu0 %v780_v13 }
  0x87   :  { %789 = vmatpush3.bf16.msra.mxu1 %v788_v11  ;;  %p988_p3 = por %p987_p2, %p986_p1 }
  0x88   :  { %766 = vmatprep.subr.mxu1 %v1048_v1 }
  0x89   :  { %783 = vmatpush3.bf16.msra.mxu0 %v780_v13  ;;  %p989_p4 = pnand %p988_p3, %p982_p0 }
  0x8a   :  { %753 = vmatmul.mubr.msk.f32.vlgmr.msra.gmra.mrb[0].mxu1 %vm126_vm1, %v121_v15  ;;  %791 = vmatprep.subr.bf16.mxu0 %v790_v20 }
  0x8b   :  { %767 = vmatpush3.msra.mxu1 %v119_v14  ;;  %768 = vmatprep.mubr.msk.f32.mxu1 %vm1047_vm0, %v1048_v1 }
  0x8c   :  { %771 = vmatprep.subr.mxu1 %v1048_v1  ;;  %742 = vmatmul.mubr.msk.f32.vlgmr.msra.gmra.mrb[0].mxu0 %vm126_vm1, %v1200_v16 }
  0x8d   :  { %793 = vmatpush3.bf16.msra.mxu0 %v790_v20 }
  0x8e   :  { %795 = vmatprep.subr.bf16.mxu0 %v794_v22 }
  0x91   :  { %797 = vmatpush3.bf16.msra.mxu0 %v794_v22 }
 0x15d   :  { %v288_v29 = vpop.f32.mrb[0].mxu1 }
 0x15e   :  { %v289_v31 = vadd.f32 %v705_v28, %v288_v29  ;;  %v754_v33 = vpop.f32.mrb[1].mxu1 }
 0x15f   :  { %v743_v35 = vpop.f32.mrb[0].mxu0 }
 0x160   :  { %v299_v34 = vadd.f32 %v707_v30, %v289_v31  ;;  %v199_v36 = vpop.f32.mrb[1].mxu0 }
 0x162   :  { %v307_v37 = vrot.slane %v299_v34, %v306_v32 }
 0x164   :  { %v308_v39 = vcombine.high %v307_v37, %v307_v37  ;;  %v315_v40 = vrot.slane %v307_v37, %v306_v32 }
 0x166   :  { %v322_v41 = vrot.slane %v308_v39, %v306_v32  ;;  %v326_v42 = vrot.slane %v315_v40, %v325_v38 }
 0x168   :  { %v330_v43 = vrot.slane %v322_v41, %v325_v38  ;;  %v333_v44 = vadd.f32 %v326_v42, %v199_v36 }
 0x16a   :  { %v334_v45 = vadd.f32 %v743_v35, %v330_v43  ;;  %815 = vtanh.f32 %v333_v44 }
 0x16c   :  { %817 = vtanh.f32 %v334_v45 }
 0x174   :  { %v816_v46 = vpop.eup %815 }
 0x175   :  { %763 = vmatprep.mubr.msk.f32.mxu0 %vm126_vm1, %v816_v46 }
 0x176   :  { %v818_v47 = vpop.eup %817 }
 0x177   :  { %764 = vmatmul.mubr.msk.f32.vlgmr.msra.gmra.mrb[2].mxu0 %vm126_vm1, %v818_v47 }
 0x24a   :  { %v765_v48 = vpop.f32.mrb[2].mxu0 }
 0x24b   :  { %v413_v49 = vpop.f32.mrb[3].mxu0 }
 0x24c   :  { %422 = vxpose.xlu0.b32.start.end [1/1] (short) (narrow) %v413_v49, 8 }
 0x250   :  { %454 = vxpose.xlu0.b32.start.end [1/1] (short) (narrow) %v765_v48, 8 }
 0x2cc   :  { %v438_v50 = vpop.trf.xlu0 }
 0x2cd   :  { %v487_v51 = vsel %vm486_vm2, %v438_v50, -inf }
 0x2ce   :  { %488 = vmax.xlane.f32.xlu1 %v487_v51 }
 0x2d0   :  { %v470_v52 = vpop.trf.xlu0 }
 0x2d1   :  { %v490_v53 = vsel %vm486_vm2, %v470_v52, -inf }
 0x2d2   :  { %491 = vmax.xlane.f32.xlu1 %v490_v53 }
 0x35b   :  { %v489_v54 = vpop.xlane.xlu1 %488 }
 0x35c   :  { %v493_v55 = vsub.f32 %v438_v50, %v489_v54 }
 0x35e   :  { %v495_v56 = vmul.f32 1.442695, %v493_v55 }
 0x35f   :  { %v492_v57 = vpop.xlane.xlu1 %491 }
 0x360   :  { %819 = vpow2.f32 %v495_v56  ;;  %v494_v58 = vsub.f32 %v470_v52, %v492_v57 }
 0x362   :  { %v497_v59 = vmul.f32 1.442695, %v494_v58 }
 0x364   :  { %821 = vpow2.f32 %v497_v59 }
 0x36a   :  { %v820_v60 = vpop.eup %819 }
 0x36b   :  { %v499_v61 = vsel %vm486_vm2, %v820_v60, 0.0 }
 0x36c   :  { %500 = vadd.xlane.f32.xlu0 %v499_v61 }
 0x36e   :  { %v822_v62 = vpop.eup %821 }
 0x36f   :  { %v502_v63 = vsel %vm486_vm2, %v822_v62, 0.0 }
 0x370   :  { %503 = vadd.xlane.f32.xlu1 %v502_v63 }
 0x3f9   :  { %v501_v0 = vpop.xlane.xlu0 %500 }
 0x3fa   :  { %823 = vrcp.f32 %v501_v0 }
 0x3fd   :  { %v504_v2 = vpop.xlane.xlu1 %503 }
 0x3fe   :  { %825 = vrcp.f32 %v504_v2 }
 0x404   :  { %v824_v3 = vpop.eup %823 }
 0x405   :  { %v507_v4 = vmul.f32 %v824_v3, %v501_v0 }
 0x407   :  { %v509_v5 = vsub.f32 2.0, %v507_v4 }
 0x408   :  { %v826_v6 = vpop.eup %825 }
 0x409   :  { %v511_v7 = vmul.f32 %v824_v3, %v509_v5  ;;  %v508_v8 = vmul.f32 %v826_v6, %v504_v2 }
 0x40b   :  { %v513_v9 = vmul.f32 %v820_v60, %v511_v7  ;;  %v510_v10 = vsub.f32 2.0, %v508_v8 }
 0x40d   :  { %515 = vst.msk [vmem:[#allocation15] sm:$0xf] %vm486_vm2, %v513_v9  ;;  %v512_v11 = vmul.f32 %v826_v6, %v510_v10  ;;  %769 = vmatmul.mubr.msk.f32.vlgmr.msra.gmra.mrb[2].mxu1 %vm517_vm3, %v513_v9 }
 0x40e   :  { %772 = vmatpush3.msra.mxu1 %v1200_v16  ;;  %773 = vmatprep.mubr.msk.f32.mxu1 %vm1047_vm0, %v1048_v1 }
 0x40f   :  { %v514_v12 = vmul.f32 %v822_v62, %v512_v11 }
 0x411   :  { %516 = vst.msk [vmem:[#allocation15 + $0x4] sm:$0xf] %vm486_vm2, %v514_v12  ;;  %774 = vmatmul.mubr.msk.f32.vlgmr.msra.gmra.mrb[4].mxu1 %vm517_vm3, %v514_v12 }
 0x412   :  { %992 = shalt.err (!%p989_p4)
}
 0x413   :  { %s993_s24 = scalar_lea.hbm %s1250_s8, 128 }
 0x414   :  { %p994_p5 = scmp.ne.s32.totalorder %s1250_s8, %s993_s24  ;;  %p997_p6 = scmp.lt.u32.totalorder %s993_s24, %s1250_s8 }
 0x416   :  { %p999_p7 = pnand %p997_p6, %p994_p5 }
 0x418   :  { %1002 = shalt.err (!%p999_p7)
}
 0x419   :  { %s1051_s1 = smov 64   ;;  %s1052_s28 = smov 4   ;;  %vm664_vm4 = vcmask 257024  }
 0x41a   :  { %690 = dma.vmem_to_hbm [thread:$0]  %s685_s15, 128, %s1250_s8, [#allocation16], %s1051_s1, %s1051_s1, %s1052_s28  }
 0x41b   :  { %s1053_s11 = smov [#allocation14]  }
 0x41c   :  { %s672_s5 = sshll.u32 %s1053_s11, 4  ;;  %s673_s5 = int_to_ptr.vmem [resolvable:$true] %s672_s5 }
 0x41d   :  { %s1003_s2 = scalar_lea.vmem %s673_s5, 128  ;;  %p1008_p9 = scmp.lt.s32.totalorder %s673_s5, %s673_s5 }
 0x41e   :  { %p1004_p8 = scmp.ne.s32.totalorder %s673_s5, %s1003_s2  ;;  %p1009_p10 = scmp.lt.s32.totalorder %s1003_s2, %s1003_s2 }
 0x420   :  { %p1010_p11 = por %p1009_p10, %p1008_p9 }
 0x422   :  { %p1011_p12 = pnand %p1010_p11, %p1004_p8 }
 0x4e0   :  { %v587_v1 = vpop.f32.mrb[2].mxu1 }
 0x4e1   :  { %665 = vst.msk [vmem:[#allocation14] sm:$0xf] %vm664_vm4, %v587_v1  ;;  %v770_v13 = vpop.f32.mrb[3].mxu1 }
 0x4e4   :  { %v660_v14 = vpop.f32.mrb[4].mxu1 }
 0x4e5   :  { %666 = vst.msk [vmem:[#allocation14 + $0x4] sm:$0xf] %vm664_vm4, %v660_v14  ;;  %v775_v15 = vpop.f32.mrb[5].mxu1 }
 0x4e6   :  { %1014 = shalt.err (!%p1011_p12)
}
 0x4e7   :  { %s1015_s8 = scalar_lea.hbm %s1249_s7, 128 }
 0x4e8   :  { %p1016_p13 = scmp.ne.s32.totalorder %s1249_s7, %s1015_s8  ;;  %p1019_p0 = scmp.lt.u32.totalorder %s1015_s8, %s1249_s7 }
 0x4ea   :  { %p1021_p1 = pnand %p1019_p0, %p1016_p13 }
 0x4ec   :  { %1024 = shalt.err (!%p1021_p1)
}
 0x4ed   :  { %678 = dma.vmem_to_hbm [thread:$0]  %s673_s5, 128, %s1249_s7, [#allocation4], %s1051_s1, %s1051_s1, %s1052_s28  }
 0x4ee   :  { %1033 = dma.done.wait [#allocation4], 128  }
 0x4ef   :  { %1034 = vsyncadd [#allocation4], 4294967168 }
 0x4f0   :  { %1035 = dma.done.wait [#allocation16], 128  }
 0x4f1   :  { %1036 = vsyncadd [#allocation16], 4294967168 }
 0x4f2   :  { %697 = vsyncpa [#allocation3], 1 }
 0x4f3   :  { %698 = vsyncpa [#allocation6], 1 }
 0x4f4   :  { %699 = vsyncpa [#allocation9], 1 }
 0x4f5   :  { %700 = vsyncpa [#allocation12], 1 }
 0x4f6   :  { %701 = vsyncpa [#allocation4], 1 }
 0x4f7   :  { %702 = vsyncpa [#allocation16], 1 }

// kernel: tpu_custom_call.1
= control target key start
LH: loop header
LB: loop body
LE: loop exit
PB: predicated region body
PF: predicated region fallthrough
CT: control target
= control target key end

     0   :  { %14 = vsyncpa [#allocation3], 0  ;;  %s1242_s0 = inlined_call_operand.hbm [shape: f32[2,32], index: 0, kind: input, shape index: {}]   ;;  %s1243_s1 = inlined_call_operand.hbm [shape: f32[2,8,32], index: 1, kind: input, shape index: {}]   ;;  %s1244_s2 = inlined_call_operand.hbm [shape: f32[32,32], index: 2, kind: input, shape index: {}]   ;;  %s1245_s3 = inlined_call_operand.hbm [shape: f32[1,32], index: 3, kind: input, shape index: {}]   ;;  %s1246_s4 = inlined_call_operand.hbm [shape: f32[32,32], index: 4, kind: input, shape index: {}]   ;;  %s1247_s5 = inlined_call_operand.hbm [shape: f32[1,32], index: 5, kind: input, shape index: {}]   ;;  %s1248_s6 = inlined_call_operand.hbm [shape: f32[32,4], index: 6, kind: input, shape index: {}]   ;;  %s1249_s7 = inlined_call_operand.hbm [shape: f32[2,4,32], index: 7, kind: output, shape index: {0}]   ;;  %s1250_s8 = inlined_call_operand.hbm [shape: f32[2,4,8], index: 8, kind: output, shape index: {1}]  }
   0x1   :  { %15 = vsyncpa [#allocation6], 0 }
   0x2   :  { %16 = vsyncpa [#allocation9], 0 }
   0x3   :  { %17 = vsyncpa [#allocation12], 0 }
   0x4   :  { %18 = vsyncpa [#allocation4], 0 }
   0x5   :  { %19 = vsyncpa [#allocation16], 0  ;;  %s1037_s27 = smov [#allocation5]   ;;  %s827_s9 = scalar_lea.hbm %s1243_s1, 256 }
   0x6   :  { %s35_s28 = sshll.u32 %s1037_s27, 4  ;;  %p828_p0 = scmp.ne.s32.totalorder %s1243_s1, %s827_s9  ;;  %s36_s28 = int_to_ptr.vmem [resolvable:$true] %s35_s28 }
   0x7   :  { %p831_p1 = scmp.lt.u32.totalorder %s827_s9, %s1243_s1 }
   0x9   :  { %p833_p2 = pnand %p831_p1, %p828_p0 }
   0xb   :  { %836 = shalt.err (!%p833_p2)
}
   0xc   :  { %s837_s14 = scalar_lea.vmem %s36_s28, 256  ;;  %p842_p4 = scmp.lt.s32.totalorder %s36_s28, %s36_s28 }
   0xd   :  { %p838_p3 = scmp.ne.s32.totalorder %s36_s28, %s837_s14  ;;  %p843_p5 = scmp.lt.s32.totalorder %s837_s14, %s837_s14 }
   0xf   :  { %p844_p6 = por %p843_p5, %p842_p4 }
  0x11   :  { %p845_p7 = pnand %p844_p6, %p838_p3 }
  0x13   :  { %848 = shalt.err (!%p845_p7)
}
  0x14   :  { %s1038_s15 = smov 128   ;;  %s1039_s16 = smov 8  }
  0x15   :  { %41 = dma.hbm_to_vmem [thread:$0]  %s1243_s1, 256, %s36_s28, [#allocation6], %s1038_s15, %s1038_s15, %s1039_s16  }
  0x16   :  { %s1040_s19 = smov [#allocation8]   ;;  %s1041_s21 = smov [#allocation11]  }
  0x17   :  { %s60_s20 = sshll.u32 %s1040_s19, 4  ;;  %s82_s22 = sshll.u32 %s1041_s21, 4  ;;  %s61_s20 = int_to_ptr.vmem [resolvable:$true] %s60_s20  ;;  %s83_s22 = int_to_ptr.vmem [resolvable:$true] %s82_s22 }
  0x18   :  { %s849_s25 = scalar_lea.hbm %s1245_s3, 16 }
  0x19   :  { %p850_p8 = scmp.ne.s32.totalorder %s1245_s3, %s849_s25  ;;  %p853_p9 = scmp.lt.u32.totalorder %s849_s25, %s1245_s3 }
  0x1b   :  { %p855_p10 = pnand %p853_p9, %p850_p8 }
  0x1d   :  { %858 = shalt.err (!%p855_p10)
}
  0x1e   :  { %s859_s1 = scalar_lea.vmem %s61_s20, 16  ;;  %s863_s28 = scalar_lea.vmem %s61_s20, 32 }
  0x1f   :  { %p860_p11 = scmp.ne.s32.totalorder %s61_s20, %s859_s1  ;;  %p864_p12 = scmp.lt.s32.totalorder %s61_s20, %s61_s20 }
  0x20   :  { %p865_p13 = scmp.lt.s32.totalorder %s863_s28, %s859_s1 }
  0x22   :  { %p866_p0 = por %p865_p13, %p864_p12 }
  0x24   :  { %p867_p1 = pnand %p866_p0, %p860_p11 }
  0x26   :  { %870 = shalt.err (!%p867_p1)
}
  0x27   :  { %63 = dma.hbm_to_vmem [thread:$0]  %s1245_s3, 16, %s61_s20, [#allocation9]  }
  0x28   :  { %s871_s13 = scalar_lea.hbm %s1247_s5, 16 }
  0x29   :  { %p872_p2 = scmp.ne.s32.totalorder %s1247_s5, %s871_s13  ;;  %p875_p3 = scmp.lt.u32.totalorder %s871_s13, %s1247_s5 }
  0x2b   :  { %p877_p4 = pnand %p875_p3, %p872_p2 }
  0x2d   :  { %880 = shalt.err (!%p877_p4)
}
  0x2e   :  { %s881_s21 = scalar_lea.vmem %s83_s22, 16  ;;  %s885_s23 = scalar_lea.vmem %s83_s22, 32 }
  0x2f   :  { %p882_p5 = scmp.ne.s32.totalorder %s83_s22, %s881_s21  ;;  %p886_p6 = scmp.lt.s32.totalorder %s83_s22, %s83_s22 }
  0x30   :  { %p887_p7 = scmp.lt.s32.totalorder %s885_s23, %s881_s21 }
  0x32   :  { %p888_p8 = por %p887_p7, %p886_p6 }
  0x34   :  { %p889_p9 = pnand %p888_p8, %p882_p5 }
  0x36   :  { %892 = shalt.err (!%p889_p9)
}
  0x37   :  { %85 = dma.hbm_to_vmem [thread:$0]  %s1247_s5, 16, %s83_s22, [#allocation12]  }
  0x38   :  { %s1042_s24 = smov [#allocation2]   ;;  %s1043_s26 = smov [#allocation7]  }
  0x39   :  { %s26_s25 = sshll.u32 %s1042_s24, 4  ;;  %s47_s27 = sshll.u32 %s1043_s26, 4  ;;  %s27_s25 = int_to_ptr.vmem [resolvable:$true] %s26_s25  ;;  %s48_s27 = int_to_ptr.vmem [resolvable:$true] %s47_s27 }
  0x3a   :  { %s893_s1 = scalar_lea.hbm %s1242_s0, 32 }
  0x3b   :  { %p894_p10 = scmp.ne.s32.totalorder %s1242_s0, %s893_s1  ;;  %p897_p11 = scmp.lt.u32.totalorder %s893_s1, %s1242_s0 }
  0x3d   :  { %p899_p12 = pnand %p897_p11, %p894_p10 }
  0x3f   :  { %902 = shalt.err (!%p899_p12)
}
  0x40   :  { %s903_s5 = scalar_lea.vmem %s27_s25, 32  ;;  %p908_p0 = scmp.lt.s32.totalorder %s27_s25, %s27_s25 }
  0x41   :  { %p904_p13 = scmp.ne.s32.totalorder %s27_s25, %s903_s5  ;;  %p909_p1 = scmp.lt.s32.totalorder %s903_s5, %s903_s5 }
  0x43   :  { %p910_p2 = por %p909_p1, %p908_p0 }
  0x45   :  { %p911_p3 = pnand %p910_p2, %p904_p13 }
  0x47   :  { %914 = shalt.err (!%p911_p3)
}
  0x48   :  { %29 = dma.hbm_to_vmem [thread:$0]  %s1242_s0, 32, %s27_s25, [#allocation3]  }
  0x49   :  { %s915_s17 = scalar_lea.hbm %s1244_s2, 512 }
  0x4a   :  { %p916_p4 = scmp.ne.s32.totalorder %s1244_s2, %s915_s17  ;;  %p919_p5 = scmp.lt.u32.totalorder %s915_s17, %s1244_s2 }
  0x4c   :  { %p921_p6 = pnand %p919_p5, %p916_p4 }
  0x4e   :  { %924 = shalt.err (!%p921_p6)
}
  0x4f   :  { %s925_s3 = scalar_lea.vmem %s48_s27, 512  ;;  %p930_p8 = scmp.lt.s32.totalorder %s48_s27, %s48_s27 }
  0x50   :  { %p926_p7 = scmp.ne.s32.totalorder %s48_s27, %s925_s3  ;;  %p931_p9 = scmp.lt.s32.totalorder %s925_s3, %s925_s3 }
  0x52   :  { %p932_p10 = por %p931_p9, %p930_p8 }
  0x54   :  { %p933_p11 = pnand %p932_p10, %p926_p7 }
  0x56   :  { %936 = shalt.err (!%p933_p11)
}
  0x57   :  { %53 = dma.hbm_to_vmem [thread:$0]  %s1244_s2, 512, %s48_s27, [#allocation6], %s1038_s15, %s1038_s15, %s1039_s16  }
  0x58   :  { %s1044_s24 = smov [#allocation10]   ;;  %s1045_s26 = smov [#allocation13]  }
  0x59   :  { %s69_s25 = sshll.u32 %s1044_s24, 4  ;;  %s91_s29 = sshll.u32 %s1045_s26, 4  ;;  %s70_s25 = int_to_ptr.vmem [resolvable:$true] %s69_s25  ;;  %s92_s29 = int_to_ptr.vmem [resolvable:$true] %s91_s29 }
  0x5a   :  { %s937_s28 = scalar_lea.hbm %s1246_s4, 512 }
  0x5b   :  { %p938_p12 = scmp.ne.s32.totalorder %s1246_s4, %s937_s28  ;;  %p941_p13 = scmp.lt.u32.totalorder %s937_s28, %s1246_s4 }
  0x5d   :  { %p943_p0 = pnand %p941_p13, %p938_p12 }
  0x5f   :  { %946 = shalt.err (!%p943_p0)
}
  0x60   :  { %s947_s2 = scalar_lea.vmem %s70_s25, 512  ;;  %p952_p2 = scmp.lt.s32.totalorder %s70_s25, %s70_s25 }
  0x61   :  { %p948_p1 = scmp.ne.s32.totalorder %s70_s25, %s947_s2  ;;  %p953_p3 = scmp.lt.s32.totalorder %s947_s2, %s947_s2 }
  0x63   :  { %p954_p4 = por %p953_p3, %p952_p2 }
  0x65   :  { %p955_p5 = pnand %p954_p4, %p948_p1 }
  0x67   :  { %958 = shalt.err (!%p955_p5)
}
  0x68   :  { %75 = dma.hbm_to_vmem [thread:$0]  %s1246_s4, 512, %s70_s25, [#allocation9], %s1038_s15, %s1038_s15, %s1039_s16  }
  0x69   :  { %s959_s14 = scalar_lea.hbm %s1248_s6, 512 }
  0x6a   :  { %p960_p6 = scmp.ne.s32.totalorder %s1248_s6, %s959_s14  ;;  %p963_p7 = scmp.lt.u32.totalorder %s959_s14, %s1248_s6 }
  0x6c   :  { %p965_p8 = pnand %p963_p7, %p960_p6 }
  0x6e   :  { %968 = shalt.err (!%p965_p8)
}
  0x6f   :  { %s969_s23 = scalar_lea.vmem %s92_s29, 512  ;;  %p974_p10 = scmp.lt.s32.totalorder %s92_s29, %s92_s29 }
  0x70   :  { %p970_p9 = scmp.ne.s32.totalorder %s92_s29, %s969_s23  ;;  %p975_p11 = scmp.lt.s32.totalorder %s969_s23, %s969_s23 }
  0x72   :  { %p976_p12 = por %p975_p11, %p974_p10 }
  0x74   :  { %p977_p13 = pnand %p976_p12, %p970_p9 }
  0x76   :  { %980 = shalt.err (!%p977_p13)
}
  0x77   :  { %97 = dma.hbm_to_vmem [thread:$0]  %s1248_s6, 512, %s92_s29, [#allocation12], %s1038_s15, %s1038_s15, %s1039_s16  }
  0x78   :  { %1025 = dma.done.wait [#allocation3], 32  }
  0x79   :  { %1026 = vsyncadd [#allocation3], 4294967264 }
  0x7a   :  { %1027 = dma.done.wait [#allocation6], 768  }
  0x7b   :  { %1028 = vsyncadd [#allocation6], 4294966528 }
  0x7c   :  { %1029 = dma.done.wait [#allocation9], 528  }
  0x7d   :  { %1030 = vsyncadd [#allocation9], 4294966768 }
  0x7e   :  { %1031 = dma.done.wait [#allocation12], 528  }
  0x7f   :  { %1032 = vsyncadd [#allocation12], 4294966768  ;;  %v1046_v0 = vmov 0.0|0.0   ;;  %vm1047_vm0 = vmmov 0   ;;  %v1048_v1 = vmov 0.0   ;;  %v208_v2 = vld [vmem:[#allocation10] sm:$0xff]  ;;  %v304_v25 = vlaneseq }
  0x80   :  { %784 = vmatprep.subr.bf16.mxu1 %v1046_v0  ;;  %752 = vmatprep.mubr.msk.f32.mxu1 %vm1047_vm0, %v1048_v1  ;;  %v209_v3 = vld [vmem:[#allocation10 + $0x8] sm:$0xff]  ;;  %v210_v4 = vld [vmem:[#allocation10 + $0x10] sm:$0xff]  ;;  %v211_v6 = vld [vmem:[#allocation10 + $0x18] sm:$0xff]  ;;  %vm126_vm1 = vcmask 261120   ;;  %v1049_v23 = vmov 1966171168  }
  0x81   :  { %v785_v5 = vpack.c.bf16 %v209_v3, %v208_v2  ;;  %v122_v7 = vld [vmem:[#allocation7] sm:$0xff]  ;;  %v123_v8 = vld [vmem:[#allocation7 + $0x8] sm:$0xff]  ;;  %v124_v9 = vld [vmem:[#allocation7 + $0x10] sm:$0xff]  ;;  %v788_v11 = vpack.c.bf16 %v211_v6, %v210_v4  ;;  %v302_v24 = vunpack.c.l.s4 %v1049_v23  ;;  %v305_v27 = vshrl.u32 %v304_v25, 7  ;;  %s1050_s6 = smov [#allocation15]  }
  0x82   :  { %v125_v10 = vld [vmem:[#allocation7 + $0x18] sm:$0xff]  ;;  %v776_v12 = vpack.c.bf16 %v123_v8, %v122_v7  ;;  %v119_v14 = vld [vmem:[#allocation5] sm:$0xff]  ;;  %v121_v15 = vld [vmem:[#allocation2] sm:$0x3]  ;;  %vm486_vm2 = vcmask 60416   ;;  %vm517_vm3 = vcmask 64512  }
  0x83   :  { %786 = vmatpush3.bf16.msra.mxu1 %v785_v5  ;;  %v780_v13 = vpack.c.bf16 %v125_v10, %v124_v9  ;;  %741 = vmatprep.mubr.msk.f32.mxu0 %vm126_vm1, %v119_v14  ;;  %v1200_v16 = vld [vmem:[#allocation5 + $0x8] sm:$0xff]  ;;  %v337_v17 = vld [vmem:[#allocation13] sm:$0xff]  ;;  %v338_v18 = vld [vmem:[#allocation13 + $0x8] sm:$0xff]  ;;  %v303_v26 = vunpack.c.0.s8 %v302_v24  ;;  %v325_v38 = vsub.s32 0, %v305_v27  ;;  %s684_s15 = sshll.u32 %s1050_s6, 4  ;;  %s685_s15 = int_to_ptr.vmem [resolvable:$true] %s684_s15 }
  0x84   :  { %787 = vmatprep.subr.bf16.mxu1 %v1046_v0  ;;  %777 = vmatprep.subr.bf16.mxu0 %v776_v12  ;;  %v339_v19 = vld [vmem:[#allocation13 + $0x10] sm:$0xff]  ;;  %v790_v20 = vpack.c.bf16 %v338_v18, %v337_v17  ;;  %v340_v21 = vld [vmem:[#allocation13 + $0x18] sm:$0xff]  ;;  %s981_s16 = scalar_lea.vmem %s685_s15, 128  ;;  %p986_p1 = scmp.lt.s32.totalorder %s685_s15, %s685_s15 }
  0x85   :  { %779 = vmatpush3.bf16.msra.mxu0 %v776_v12  ;;  %v794_v22 = vpack.c.bf16 %v340_v21, %v339_v19  ;;  %v705_v28 = vld [vmem:[#allocation8] ss:$0 sm:$0xff]  ;;  %v707_v30 = vld [vmem:[#allocation11] ss:$0 sm:$0xff]  ;;  %v306_v32 = vsub.s32 %v303_v26, %v305_v27  ;;  %p982_p0 = scmp.ne.s32.totalorder %s685_s15, %s981_s16  ;;  %p987_p2 = scmp.lt.s32.totalorder %s981_s16, %s981_s16 }
  0x86   :  { %781 = vmatprep.subr.bf16.mxu0 %v780_v13 }
  0x87   :  { %789 = vmatpush3.bf16.msra.mxu1 %v788_v11  ;;  %p988_p3 = por %p987_p2, %p986_p1 }
  0x88   :  { %766 = vmatprep.subr.mxu1 %v1048_v1 }
  0x89   :  { %783 = vmatpush3.bf16.msra.mxu0 %v780_v13  ;;  %p989_p4 = pnand %p988_p3, %p982_p0 }
  0x8a   :  { %753 = vmatmul.mubr.msk.f32.vlgmr.msra.gmra.mrb[0].mxu1 %vm126_vm1, %v121_v15  ;;  %791 = vmatprep.subr.bf16.mxu0 %v790_v20 }
  0x8b   :  { %767 = vmatpush3.msra.mxu1 %v119_v14  ;;  %768 = vmatprep.mubr.msk.f32.mxu1 %vm1047_vm0, %v1048_v1 }
  0x8c   :  { %771 = vmatprep.subr.mxu1 %v1048_v1  ;;  %742 = vmatmul.mubr.msk.f32.vlgmr.msra.gmra.mrb[0].mxu0 %vm126_vm1, %v1200_v16 }
  0x8d   :  { %793 = vmatpush3.bf16.msra.mxu0 %v790_v20 }
  0x8e   :  { %795 = vmatprep.subr.bf16.mxu0 %v794_v22 }
  0x91   :  { %797 = vmatpush3.bf16.msra.mxu0 %v794_v22 }
 0x15d   :  { %v288_v29 = vpop.f32.mrb[0].mxu1 }
 0x15e   :  { %v289_v31 = vadd.f32 %v705_v28, %v288_v29  ;;  %v754_v33 = vpop.f32.mrb[1].mxu1 }
 0x15f   :  { %v743_v35 = vpop.f32.mrb[0].mxu0 }
 0x160   :  { %v299_v34 = vadd.f32 %v707_v30, %v289_v31  ;;  %v199_v36 = vpop.f32.mrb[1].mxu0 }
 0x162   :  { %v307_v37 = vrot.slane %v299_v34, %v306_v32 }
 0x164   :  { %v308_v39 = vcombine.high %v307_v37, %v307_v37  ;;  %v315_v40 = vrot.slane %v307_v37, %v306_v32 }
 0x166   :  { %v322_v41 = vrot.slane %v308_v39, %v306_v32  ;;  %v326_v42 = vrot.slane %v315_v40, %v325_v38 }
 0x168   :  { %v330_v43 = vrot.slane %v322_v41, %v325_v38  ;;  %v333_v44 = vadd.f32 %v326_v42, %v199_v36 }
 0x16a   :  { %v334_v45 = vadd.f32 %v743_v35, %v330_v43  ;;  %815 = vtanh.f32 %v333_v44 }
 0x16c   :  { %817 = vtanh.f32 %v334_v45 }
 0x174   :  { %v816_v46 = vpop.eup %815 }
 0x175   :  { %763 = vmatprep.mubr.msk.f32.mxu0 %vm126_vm1, %v816_v46 }
 0x176   :  { %v818_v47 = vpop.eup %817 }
 0x177   :  { %764 = vmatmul.mubr.msk.f32.vlgmr.msra.gmra.mrb[2].mxu0 %vm126_vm1, %v818_v47 }
 0x24a   :  { %v765_v48 = vpop.f32.mrb[2].mxu0 }
 0x24b   :  { %v413_v49 = vpop.f32.mrb[3].mxu0 }
 0x24c   :  { %422 = vxpose.xlu0.b32.start.end [1/1] (short) (narrow) %v413_v49, 8 }
 0x250   :  { %454 = vxpose.xlu0.b32.start.end [1/1] (short) (narrow) %v765_v48, 8 }
 0x2cc   :  { %v438_v50 = vpop.trf.xlu0 }
 0x2cd   :  { %v487_v51 = vsel %vm486_vm2, %v438_v50, -inf }
 0x2ce   :  { %488 = vmax.xlane.f32.xlu1 %v487_v51 }
 0x2d0   :  { %v470_v52 = vpop.trf.xlu0 }
 0x2d1   :  { %v490_v53 = vsel %vm486_vm2, %v470_v52, -inf }
 0x2d2   :  { %491 = vmax.xlane.f32.xlu1 %v490_v53 }
 0x35b   :  { %v489_v54 = vpop.xlane.xlu1 %488 }
 0x35c   :  { %v493_v55 = vsub.f32 %v438_v50, %v489_v54 }
 0x35e   :  { %v495_v56 = vmul.f32 1.442695, %v493_v55 }
 0x35f   :  { %v492_v57 = vpop.xlane.xlu1 %491 }
 0x360   :  { %819 = vpow2.f32 %v495_v56  ;;  %v494_v58 = vsub.f32 %v470_v52, %v492_v57 }
 0x362   :  { %v497_v59 = vmul.f32 1.442695, %v494_v58 }
 0x364   :  { %821 = vpow2.f32 %v497_v59 }
 0x36a   :  { %v820_v60 = vpop.eup %819 }
 0x36b   :  { %v499_v61 = vsel %vm486_vm2, %v820_v60, 0.0 }
 0x36c   :  { %500 = vadd.xlane.f32.xlu0 %v499_v61 }
 0x36e   :  { %v822_v62 = vpop.eup %821 }
 0x36f   :  { %v502_v63 = vsel %vm486_vm2, %v822_v62, 0.0 }
 0x370   :  { %503 = vadd.xlane.f32.xlu1 %v502_v63 }
 0x3f9   :  { %v501_v0 = vpop.xlane.xlu0 %500 }
 0x3fa   :  { %823 = vrcp.f32 %v501_v0 }
 0x3fd   :  { %v504_v2 = vpop.xlane.xlu1 %503 }
 0x3fe   :  { %825 = vrcp.f32 %v504_v2 }
 0x404   :  { %v824_v3 = vpop.eup %823 }
 0x405   :  { %v507_v4 = vmul.f32 %v824_v3, %v501_v0 }
 0x407   :  { %v509_v5 = vsub.f32 2.0, %v507_v4 }
 0x408   :  { %v826_v6 = vpop.eup %825 }
 0x409   :  { %v511_v7 = vmul.f32 %v824_v3, %v509_v5  ;;  %v508_v8 = vmul.f32 %v826_v6, %v504_v2 }
 0x40b   :  { %v513_v9 = vmul.f32 %v820_v60, %v511_v7  ;;  %v510_v10 = vsub.f32 2.0, %v508_v8 }
 0x40d   :  { %515 = vst.msk [vmem:[#allocation15] sm:$0xf] %vm486_vm2, %v513_v9  ;;  %v512_v11 = vmul.f32 %v826_v6, %v510_v10  ;;  %769 = vmatmul.mubr.msk.f32.vlgmr.msra.gmra.mrb[2].mxu1 %vm517_vm3, %v513_v9 }
 0x40e   :  { %772 = vmatpush3.msra.mxu1 %v1200_v16  ;;  %773 = vmatprep.mubr.msk.f32.mxu1 %vm1047_vm0, %v1048_v1 }
 0x40f   :  { %v514_v12 = vmul.f32 %v822_v62, %v512_v11 }
 0x411   :  { %516 = vst.msk [vmem:[#allocation15 + $0x4] sm:$0xf] %vm486_vm2, %v514_v12  ;;  %774 = vmatmul.mubr.msk.f32.vlgmr.msra.gmra.mrb[4].mxu1 %vm517_vm3, %v514_v12 }
 0x412   :  { %992 = shalt.err (!%p989_p4)
}
 0x413   :  { %s993_s24 = scalar_lea.hbm %s1250_s8, 128 }
 0x414   :  { %p994_p5 = scmp.ne.s32.totalorder %s1250_s8, %s993_s24  ;;  %p997_p6 = scmp.lt.u32.totalorder %s993_s24, %s1250_s8 }
 0x416   :  { %p999_p7 = pnand %p997_p6, %p994_p5 }
 0x418   :  { %1002 = shalt.err (!%p999_p7)
}
 0x419   :  { %s1051_s1 = smov 64   ;;  %s1052_s28 = smov 4   ;;  %vm664_vm4 = vcmask 257024  }
 0x41a   :  { %690 = dma.vmem_to_hbm [thread:$0]  %s685_s15, 128, %s1250_s8, [#allocation16], %s1051_s1, %s1051_s1, %s1052_s28  }
 0x41b   :  { %s1053_s11 = smov [#allocation14]  }
 0x41c   :  { %s672_s5 = sshll.u32 %s1053_s11, 4  ;;  %s673_s5 = int_to_ptr.vmem [resolvable:$true] %s672_s5 }
 0x41d   :  { %s1003_s2 = scalar_lea.vmem %s673_s5, 128  ;;  %p1008_p9 = scmp.lt.s32.totalorder %s673_s5, %s673_s5 }
 0x41e   :  { %p1004_p8 = scmp.ne.s32.totalorder %s673_s5, %s1003_s2  ;;  %p1009_p10 = scmp.lt.s32.totalorder %s1003_s2, %s1003_s2 }
 0x420   :  { %p1010_p11 = por %p1009_p10, %p1008_p9 }
 0x422   :  { %p1011_p12 = pnand %p1010_p11, %p1004_p8 }
 0x4e0   :  { %v587_v1 = vpop.f32.mrb[2].mxu1 }
 0x4e1   :  { %665 = vst.msk [vmem:[#allocation14] sm:$0xf] %vm664_vm4, %v587_v1  ;;  %v770_v13 = vpop.f32.mrb[3].mxu1 }
 0x4e4   :  { %v660_v14 = vpop.f32.mrb[4].mxu1 }
 0x4e5   :  { %666 = vst.msk [vmem:[#allocation14 + $0x4] sm:$0xf] %vm664_vm4, %v660_v14  ;;  %v775_v15 = vpop.f32.mrb[5].mxu1 }
 0x4e6   :  { %1014 = shalt.err (!%p1011_p12)
}
 0x4e7   :  { %s1015_s8 = scalar_lea.hbm %s1249_s7, 128 }
 0x4e8   :  { %p1016_p13 = scmp.ne.s32.totalorder %s1249_s7, %s1015_s8  ;;  %p1019_p0 = scmp.lt.u32.totalorder %s1015_s8, %s1249_s7 }
 0x4ea   :  { %p1021_p1 = pnand %p1019_p0, %p1016_p13 }
 0x4ec   :  { %1024 = shalt.err (!%p1021_p1)
}
 0x4ed   :  { %678 = dma.vmem_to_hbm [thread:$0]  %s673_s5, 128, %s1249_s7, [#allocation4], %s1051_s1, %s1051_s1, %s1052_s28  }
 0x4ee   :  { %1033 = dma.done.wait [#allocation4], 128  }
 0x4ef   :  { %1034 = vsyncadd [#allocation4], 4294967168 }
 0x4f0   :  { %1035 = dma.done.wait [#allocation16], 128  }
 0x4f1   :  { %1036 = vsyncadd [#allocation16], 4294967168 }
 0x4f2   :  { %697 = vsyncpa [#allocation3], 1 }
 0x4f3   :  { %698 = vsyncpa [#allocation6], 1 }
 0x4f4   :  { %699 = vsyncpa [#allocation9], 1 }
 0x4f5   :  { %700 = vsyncpa [#allocation12], 1 }
 0x4f6   :  { %701 = vsyncpa [#allocation4], 1 }
 0x4f7   :  { %702 = vsyncpa [#allocation16], 1 }

</bundles_post_ra>
